<compile_context>
chip_gen: v5e
topology: v5e:2x2
jax: 0.10.0
libtpu: 0.0.40
codegen_flags: <defaults>
</compile_context>

<pallas_src>
import functools

import jax
import jax.numpy as jnp
from jax.experimental import pallas as pl
from jax.experimental.pallas import tpu as pltpu


def _dynconv_kernel(x_ref, m_ref, w_ref, b_ref, out_ref, *, cin, cout, W):
    """One batch image of the fused dynamic conv.

    x_ref   : (1, Cin, HWp)    f32  input image, spatial flattened & lane-dense
    m_ref   : (9, HWp)         f32  0/1 border-validity mask per 3x3 tap
    w_ref   : (1, Cout, 9*Cin) f32  per-batch folded weight (BN scale * att scale)
    b_ref   : (1, Cout, 1)     f32  per-batch folded bias
    out_ref : (1, Cout, HWp)   f32  NCHW-flat output (lane-dense, unmasked stores)
    """
    x = x_ref[0]                          # (Cin, HWp)
    wmat = w_ref[0]                       # (Cout, 9*Cin)
    masks = m_ref[...]                    # (9, HWp)
    hwp = x.shape[-1]

    acc = jnp.zeros((cout, hwp), jnp.float32)
    for t in range(9):                    # static unroll over the 3x3 taps
        dy, dx = t // 3, t % 3
        # Output column c needs source column c + s, where s is the flat offset
        # of x[h + dy - 1, w + dx - 1]; realised as a lane rotation of x.
        s = ((dy - 1) * W + (dx - 1)) % hwp
        tap = x if s == 0 else jnp.concatenate([x[:, s:], x[:, :s]], axis=1)
        if t != 4:                        # center tap never crosses the border
            tap = tap * masks[t:t + 1, :]    # zero-padding boundary condition
        w_t = wmat[:, t * cin:(t + 1) * cin]                   # (Cout, Cin)
        acc = acc + jnp.dot(w_t, tap, preferred_element_type=jnp.float32)

    acc = acc + b_ref[0]                                # conv-bias + BN (+ att scale)
    out_ref[0] = jnp.where(acc > 0, acc, 0.01 * acc)    # LeakyReLU(0.01)


def dynamic_conv2d(x_nchw, params, *, k=8):
    """Pallas implementation of DynamicConv2D.forward. x_nchw: (B, Cin, H, W)."""
    del k  # attention shapes come from the params; kept for API parity
    B, Cin, H, W = x_nchw.shape
    Cout = params["w_conv_oihw"].shape[0]
    HW = H * W
    HWp = ((HW + 127) // 128) * 128       # lane-dense spatial axis
    x = x_nchw.astype(jnp.float32)

    # ---- attention branch (GAP -> MLP -> softmax): tiny contractions, plain JAX
    pooled = jnp.mean(x, axis=(2, 3))                                  # (B, Cin)
    h1 = pooled @ params["w1"].T + params["b1"]
    h1 = jnp.where(h1 > 0, h1, 0.01 * h1)                              # LeakyReLU
    logits = h1 @ params["w2"].T + params["b2"]
    att = jax.nn.softmax(logits / 0.7, axis=-1)                        # (B, k)
    # sum_i att_i == 1 mathematically; folded (not dropped) to stay faithful.
    att_scale = jnp.sum(att, axis=-1)                                  # (B,)

    # ---- fold conv bias + eval BatchNorm + per-batch dynamic scale into w/b ----
    # scale * LeakyReLU(y) == LeakyReLU(scale * y) because scale > 0.
    bn_scale = params["bn_gamma"] / jnp.sqrt(params["bn_var"] + 1e-5)  # (Cout,)
    w_r = jnp.transpose(params["w_conv_oihw"], (0, 2, 3, 1)).reshape(Cout, 9 * Cin)
    w_fold = w_r * bn_scale[:, None]                                   # (Cout, 9*Cin)
    b_fold = (params["b_conv"] * bn_scale
              + params["bn_beta"] - params["bn_mean"] * bn_scale)      # (Cout,)
    w_eff = (att_scale[:, None, None] * w_fold[None]).astype(jnp.float32)   # (B, Cout, 9*Cin)
    b_eff = (att_scale[:, None] * b_fold[None]).reshape(B, Cout, 1).astype(jnp.float32)

    # ---- stream x once (no im2col): flatten spatial, pad lanes to 128 ----------
    x_flat = x.reshape(B, Cin, HW)
    if HWp != HW:
        x_flat = jnp.pad(x_flat, ((0, 0), (0, 0), (0, HWp - HW)))

    # ---- 0/1 border-validity masks for the nine 3x3 taps (tiny, shared) --------
    idx = jnp.arange(HWp, dtype=jnp.int32)
    row, col = idx // W, idx % W
    mask_rows = []
    for dy in range(3):
        for dx in range(3):
            ok = jnp.ones((HWp,), jnp.bool_)
            if dy == 0:
                ok = ok & (row > 0)
            if dy == 2:
                ok = ok & (row < H - 1)
            if dx == 0:
                ok = ok & (col > 0)
            if dx == 2:
                ok = ok & (col < W - 1)
            mask_rows.append(ok)
    mask9 = jnp.stack(mask_rows).astype(jnp.float32)                   # (9, HWp)

    kernel = functools.partial(_dynconv_kernel, cin=Cin, cout=Cout, W=W)

    # Per-step VMEM footprint ~ (3*Cin + 3*Cout) * HWp * 4 bytes (double-buffered
    # in/out blocks + tap/accumulator temporaries) -- comfortably inside 48 MiB
    # for the activation sizes this module sees on all of v5e/v6e/v7x.
    # TODO(synk): for very large H*W, switch to row-strip spatial tiling with a
    # 1-row halo (pl.ANY + manual DMA) instead of whole-image blocks.
    out_flat = pl.pallas_call(
        kernel,
        out_shape=jax.ShapeDtypeStruct((B, Cout, HWp), jnp.float32),
        grid=(B,),
        in_specs=[
            pl.BlockSpec((1, Cin, HWp), lambda b: (b, 0, 0)),
            pl.BlockSpec((9, HWp), lambda b: (0, 0)),
            pl.BlockSpec((1, Cout, 9 * Cin), lambda b: (b, 0, 0)),
            pl.BlockSpec((1, Cout, 1), lambda b: (b, 0, 0)),
        ],
        out_specs=pl.BlockSpec((1, Cout, HWp), lambda b: (b, 0, 0)),
        compiler_params=pltpu.CompilerParams(
            dimension_semantics=("parallel",),
            vmem_limit_bytes=48 * 1024 * 1024),
    )(x_flat, mask9, w_eff, b_eff)

    out = out_flat if HWp == HW else out_flat[:, :, :HW]
    # Output is already NCHW-flat -> contiguous reshape, no transpose.
    return out.reshape(B, Cout, H, W)


def reference(x_nchw, params, *, k=8):
    """Pure-JAX reference mirroring the PyTorch forward (eval-mode BN)."""
    pooled = jnp.mean(x_nchw, axis=(2, 3))
    h1 = pooled @ params["w1"].T + params["b1"]
    h1 = jnp.where(h1 > 0, h1, 0.01 * h1)
    logits = h1 @ params["w2"].T + params["b2"]
    att = jax.nn.softmax(logits / 0.7, axis=-1)

    conv = jax.lax.conv_general_dilated(
        x_nchw, params["w_conv_oihw"], (1, 1), "SAME",
        dimension_numbers=("NCHW", "OIHW", "NCHW"))
    conv = conv + params["b_conv"][None, :, None, None]
    scale = params["bn_gamma"] / jnp.sqrt(params["bn_var"] + 1e-5)
    shift = params["bn_beta"] - params["bn_mean"] * scale
    conv = conv * scale[None, :, None, None] + shift[None, :, None, None]
    conv = jnp.where(conv > 0, conv, 0.01 * conv)

    feat = att[:, 0][:, None, None, None] * conv
    for i in range(1, k):
        feat = feat + att[:, i][:, None, None, None] * conv
    return feat


def make_params(key, in_plane, out_plane, k):
    ks = jax.random.split(key, 10)
    return {
        "w_conv_oihw": 0.1 * jax.random.normal(ks[0], (out_plane, in_plane, 3, 3), jnp.float32),
        "b_conv":      0.01 * jax.random.normal(ks[1], (out_plane,), jnp.float32),
        "bn_gamma":    jax.random.uniform(ks[2], (out_plane,), jnp.float32, 0.8, 1.2),
        "bn_beta":     0.05 * jax.random.normal(ks[3], (out_plane,), jnp.float32),
        "bn_mean":     0.05 * jax.random.normal(ks[4], (out_plane,), jnp.float32),
        "bn_var":      jax.random.uniform(ks[5], (out_plane,), jnp.float32, 0.5, 1.5),
        "w1":          0.1 * jax.random.normal(ks[6], (2 * k, in_plane), jnp.float32),
        "b1":          0.01 * jax.random.normal(ks[7], (2 * k,), jnp.float32),
        "w2":          0.1 * jax.random.normal(ks[8], (k, 2 * k), jnp.float32),
        "b2":          0.01 * jax.random.normal(ks[9], (k,), jnp.float32),
    }


if __name__ == "__main__":
    B, Cin, H, W = 2, 4, 16, 16
    Cout, K = 32, 8

    key = jax.random.PRNGKey(0)
    kx, kp = jax.random.split(key)
    x = jax.random.normal(kx, (B, Cin, H, W), jnp.float32)
    params = make_params(kp, Cin, Cout, K)

    out = jax.block_until_ready(dynamic_conv2d(x, params, k=K))
    ref = jax.block_until_ready(reference(x, params, k=K))

    assert out.shape == (B, Cout, H, W), out.shape
    assert bool(jnp.allclose(out, ref, rtol=1e-3, atol=1e-3)), "mismatch vs reference"
    print("KERNEL_OK")
</pallas_src>

<mosaic_0001>
module attributes {stable_mosaic.version = 11 : i64} {
  func.func @_dynconv_kernel(%arg0: i32, %arg1: memref<1x4x256xf32, #tpu.memory_space<vmem>>, %arg2: memref<9x256xf32, #tpu.memory_space<vmem>>, %arg3: memref<1x32x36xf32, #tpu.memory_space<vmem>>, %arg4: memref<1x32x1xf32, #tpu.memory_space<vmem>>, %arg5: memref<1x32x256xf32, #tpu.memory_space<vmem>>) attributes {dimension_semantics = [#tpu.dimension_semantics<parallel>], iteration_bounds = array<i64: 2>, scalar_prefetch = 0 : i64, scratch_operands = 0 : i64, tpu.core_type = #tpu.core_type<tc>, window_params = [{transform_indices = @transform_0, window_bounds = array<i64: 1, 4, 256>}, {pipeline_mode = #tpu.pipeline_mode<synchronous>, transform_indices = @transform_1, window_bounds = array<i64: 9, 256>}, {transform_indices = @transform_2, window_bounds = array<i64: 1, 32, 36>}, {transform_indices = @transform_3, window_bounds = array<i64: 1, 32, 1>}, {transform_indices = @transform_4, window_bounds = array<i64: 1, 32, 256>}]} {
    %c0 = arith.constant 0 : index
    %c0_0 = arith.constant 0 : index
    %c0_1 = arith.constant 0 : index
    %0 = vector.load %arg1[%c0, %c0_0, %c0_1] : memref<1x4x256xf32, #tpu.memory_space<vmem>>, vector<1x4x256xf32>
    %1 = vector.shape_cast %0 : vector<1x4x256xf32> to vector<4x256xf32>
    %c0_2 = arith.constant 0 : index
    %c0_3 = arith.constant 0 : index
    %c0_4 = arith.constant 0 : index
    %2 = vector.load %arg3[%c0_2, %c0_3, %c0_4] : memref<1x32x36xf32, #tpu.memory_space<vmem>>, vector<1x32x36xf32>
    %3 = vector.shape_cast %2 : vector<1x32x36xf32> to vector<32x36xf32>
    %c0_5 = arith.constant 0 : index
    %c0_6 = arith.constant 0 : index
    %4 = vector.load %arg2[%c0_5, %c0_6] : memref<9x256xf32, #tpu.memory_space<vmem>>, vector<9x256xf32>
    %cst = arith.constant 0.000000e+00 : f32
    %5 = vector.broadcast %cst : f32 to vector<32x256xf32>
    %6 = vector.extract_strided_slice %1 {offsets = [0, 239], sizes = [4, 17], strides = [1, 1]} : vector<4x256xf32> to vector<4x17xf32>
    %7 = vector.extract_strided_slice %1 {offsets = [0, 0], sizes = [4, 239], strides = [1, 1]} : vector<4x256xf32> to vector<4x239xf32>
    %8 = tpu.concatenate %6, %7 in 1 : vector<4x17xf32>, vector<4x239xf32> -> vector<4x256xf32>
    %9 = vector.extract_strided_slice %4 {offsets = [0, 0], sizes = [1, 256], strides = [1, 1]} : vector<9x256xf32> to vector<1x256xf32>
    %10 = vector.broadcast %9 : vector<1x256xf32> to vector<4x256xf32>
    %11 = arith.mulf %8, %10 : vector<4x256xf32>
    %12 = vector.extract_strided_slice %3 {offsets = [0, 0], sizes = [32, 4], strides = [1, 1]} : vector<32x36xf32> to vector<32x4xf32>
    %cst_7 = arith.constant dense<0.000000e+00> : vector<32x256xf32>
    %13 = tpu.matmul %12, %11, %cst_7 {dimension_numbers = #tpu.dot_dimension_numbers<[1], [0], [0], [1], [0, 0, 1, 1], [], []>} : vector<32x4xf32>, vector<4x256xf32>, vector<32x256xf32> -> vector<32x256xf32>
    %14 = arith.addf %5, %13 : vector<32x256xf32>
    %15 = vector.extract_strided_slice %1 {offsets = [0, 240], sizes = [4, 16], strides = [1, 1]} : vector<4x256xf32> to vector<4x16xf32>
    %16 = vector.extract_strided_slice %1 {offsets = [0, 0], sizes = [4, 240], strides = [1, 1]} : vector<4x256xf32> to vector<4x240xf32>
    %17 = tpu.concatenate %15, %16 in 1 : vector<4x16xf32>, vector<4x240xf32> -> vector<4x256xf32>
    %18 = vector.extract_strided_slice %4 {offsets = [1, 0], sizes = [1, 256], strides = [1, 1]} : vector<9x256xf32> to vector<1x256xf32>
    %19 = vector.broadcast %18 : vector<1x256xf32> to vector<4x256xf32>
    %20 = arith.mulf %17, %19 : vector<4x256xf32>
    %21 = vector.extract_strided_slice %3 {offsets = [0, 4], sizes = [32, 4], strides = [1, 1]} : vector<32x36xf32> to vector<32x4xf32>
    %cst_8 = arith.constant dense<0.000000e+00> : vector<32x256xf32>
    %22 = tpu.matmul %21, %20, %cst_8 {dimension_numbers = #tpu.dot_dimension_numbers<[1], [0], [0], [1], [0, 0, 1, 1], [], []>} : vector<32x4xf32>, vector<4x256xf32>, vector<32x256xf32> -> vector<32x256xf32>
    %23 = arith.addf %14, %22 : vector<32x256xf32>
    %24 = vector.extract_strided_slice %1 {offsets = [0, 241], sizes = [4, 15], strides = [1, 1]} : vector<4x256xf32> to vector<4x15xf32>
    %25 = vector.extract_strided_slice %1 {offsets = [0, 0], sizes = [4, 241], strides = [1, 1]} : vector<4x256xf32> to vector<4x241xf32>
    %26 = tpu.concatenate %24, %25 in 1 : vector<4x15xf32>, vector<4x241xf32> -> vector<4x256xf32>
    %27 = vector.extract_strided_slice %4 {offsets = [2, 0], sizes = [1, 256], strides = [1, 1]} : vector<9x256xf32> to vector<1x256xf32>
    %28 = vector.broadcast %27 : vector<1x256xf32> to vector<4x256xf32>
    %29 = arith.mulf %26, %28 : vector<4x256xf32>
    %30 = vector.extract_strided_slice %3 {offsets = [0, 8], sizes = [32, 4], strides = [1, 1]} : vector<32x36xf32> to vector<32x4xf32>
    %cst_9 = arith.constant dense<0.000000e+00> : vector<32x256xf32>
    %31 = tpu.matmul %30, %29, %cst_9 {dimension_numbers = #tpu.dot_dimension_numbers<[1], [0], [0], [1], [0, 0, 1, 1], [], []>} : vector<32x4xf32>, vector<4x256xf32>, vector<32x256xf32> -> vector<32x256xf32>
    %32 = arith.addf %23, %31 : vector<32x256xf32>
    %33 = vector.extract_strided_slice %1 {offsets = [0, 255], sizes = [4, 1], strides = [1, 1]} : vector<4x256xf32> to vector<4x1xf32>
    %34 = vector.extract_strided_slice %1 {offsets = [0, 0], sizes = [4, 255], strides = [1, 1]} : vector<4x256xf32> to vector<4x255xf32>
    %35 = tpu.concatenate %33, %34 in 1 : vector<4x1xf32>, vector<4x255xf32> -> vector<4x256xf32>
    %36 = vector.extract_strided_slice %4 {offsets = [3, 0], sizes = [1, 256], strides = [1, 1]} : vector<9x256xf32> to vector<1x256xf32>
    %37 = vector.broadcast %36 : vector<1x256xf32> to vector<4x256xf32>
    %38 = arith.mulf %35, %37 : vector<4x256xf32>
    %39 = vector.extract_strided_slice %3 {offsets = [0, 12], sizes = [32, 4], strides = [1, 1]} : vector<32x36xf32> to vector<32x4xf32>
    %cst_10 = arith.constant dense<0.000000e+00> : vector<32x256xf32>
    %40 = tpu.matmul %39, %38, %cst_10 {dimension_numbers = #tpu.dot_dimension_numbers<[1], [0], [0], [1], [0, 0, 1, 1], [], []>} : vector<32x4xf32>, vector<4x256xf32>, vector<32x256xf32> -> vector<32x256xf32>
    %41 = arith.addf %32, %40 : vector<32x256xf32>
    %42 = vector.extract_strided_slice %3 {offsets = [0, 16], sizes = [32, 4], strides = [1, 1]} : vector<32x36xf32> to vector<32x4xf32>
    %cst_11 = arith.constant dense<0.000000e+00> : vector<32x256xf32>
    %43 = tpu.matmul %42, %1, %cst_11 {dimension_numbers = #tpu.dot_dimension_numbers<[1], [0], [0], [1], [0, 0, 1, 1], [], []>} : vector<32x4xf32>, vector<4x256xf32>, vector<32x256xf32> -> vector<32x256xf32>
    %44 = arith.addf %41, %43 : vector<32x256xf32>
    %45 = vector.extract_strided_slice %1 {offsets = [0, 1], sizes = [4, 255], strides = [1, 1]} : vector<4x256xf32> to vector<4x255xf32>
    %46 = vector.extract_strided_slice %1 {offsets = [0, 0], sizes = [4, 1], strides = [1, 1]} : vector<4x256xf32> to vector<4x1xf32>
    %47 = tpu.concatenate %45, %46 in 1 : vector<4x255xf32>, vector<4x1xf32> -> vector<4x256xf32>
    %48 = vector.extract_strided_slice %4 {offsets = [5, 0], sizes = [1, 256], strides = [1, 1]} : vector<9x256xf32> to vector<1x256xf32>
    %49 = vector.broadcast %48 : vector<1x256xf32> to vector<4x256xf32>
    %50 = arith.mulf %47, %49 : vector<4x256xf32>
    %51 = vector.extract_strided_slice %3 {offsets = [0, 20], sizes = [32, 4], strides = [1, 1]} : vector<32x36xf32> to vector<32x4xf32>
    %cst_12 = arith.constant dense<0.000000e+00> : vector<32x256xf32>
    %52 = tpu.matmul %51, %50, %cst_12 {dimension_numbers = #tpu.dot_dimension_numbers<[1], [0], [0], [1], [0, 0, 1, 1], [], []>} : vector<32x4xf32>, vector<4x256xf32>, vector<32x256xf32> -> vector<32x256xf32>
    %53 = arith.addf %44, %52 : vector<32x256xf32>
    %54 = vector.extract_strided_slice %1 {offsets = [0, 15], sizes = [4, 241], strides = [1, 1]} : vector<4x256xf32> to vector<4x241xf32>
    %55 = vector.extract_strided_slice %1 {offsets = [0, 0], sizes = [4, 15], strides = [1, 1]} : vector<4x256xf32> to vector<4x15xf32>
    %56 = tpu.concatenate %54, %55 in 1 : vector<4x241xf32>, vector<4x15xf32> -> vector<4x256xf32>
    %57 = vector.extract_strided_slice %4 {offsets = [6, 0], sizes = [1, 256], strides = [1, 1]} : vector<9x256xf32> to vector<1x256xf32>
    %58 = vector.broadcast %57 : vector<1x256xf32> to vector<4x256xf32>
    %59 = arith.mulf %56, %58 : vector<4x256xf32>
    %60 = vector.extract_strided_slice %3 {offsets = [0, 24], sizes = [32, 4], strides = [1, 1]} : vector<32x36xf32> to vector<32x4xf32>
    %cst_13 = arith.constant dense<0.000000e+00> : vector<32x256xf32>
    %61 = tpu.matmul %60, %59, %cst_13 {dimension_numbers = #tpu.dot_dimension_numbers<[1], [0], [0], [1], [0, 0, 1, 1], [], []>} : vector<32x4xf32>, vector<4x256xf32>, vector<32x256xf32> -> vector<32x256xf32>
    %62 = arith.addf %53, %61 : vector<32x256xf32>
    %63 = vector.extract_strided_slice %1 {offsets = [0, 16], sizes = [4, 240], strides = [1, 1]} : vector<4x256xf32> to vector<4x240xf32>
    %64 = vector.extract_strided_slice %1 {offsets = [0, 0], sizes = [4, 16], strides = [1, 1]} : vector<4x256xf32> to vector<4x16xf32>
    %65 = tpu.concatenate %63, %64 in 1 : vector<4x240xf32>, vector<4x16xf32> -> vector<4x256xf32>
    %66 = vector.extract_strided_slice %4 {offsets = [7, 0], sizes = [1, 256], strides = [1, 1]} : vector<9x256xf32> to vector<1x256xf32>
    %67 = vector.broadcast %66 : vector<1x256xf32> to vector<4x256xf32>
    %68 = arith.mulf %65, %67 : vector<4x256xf32>
    %69 = vector.extract_strided_slice %3 {offsets = [0, 28], sizes = [32, 4], strides = [1, 1]} : vector<32x36xf32> to vector<32x4xf32>
    %cst_14 = arith.constant dense<0.000000e+00> : vector<32x256xf32>
    %70 = tpu.matmul %69, %68, %cst_14 {dimension_numbers = #tpu.dot_dimension_numbers<[1], [0], [0], [1], [0, 0, 1, 1], [], []>} : vector<32x4xf32>, vector<4x256xf32>, vector<32x256xf32> -> vector<32x256xf32>
    %71 = arith.addf %62, %70 : vector<32x256xf32>
    %72 = vector.extract_strided_slice %1 {offsets = [0, 17], sizes = [4, 239], strides = [1, 1]} : vector<4x256xf32> to vector<4x239xf32>
    %73 = vector.extract_strided_slice %1 {offsets = [0, 0], sizes = [4, 17], strides = [1, 1]} : vector<4x256xf32> to vector<4x17xf32>
    %74 = tpu.concatenate %72, %73 in 1 : vector<4x239xf32>, vector<4x17xf32> -> vector<4x256xf32>
    %75 = vector.extract_strided_slice %4 {offsets = [8, 0], sizes = [1, 256], strides = [1, 1]} : vector<9x256xf32> to vector<1x256xf32>
    %76 = vector.broadcast %75 : vector<1x256xf32> to vector<4x256xf32>
    %77 = arith.mulf %74, %76 : vector<4x256xf32>
    %78 = vector.extract_strided_slice %3 {offsets = [0, 32], sizes = [32, 4], strides = [1, 1]} : vector<32x36xf32> to vector<32x4xf32>
    %cst_15 = arith.constant dense<0.000000e+00> : vector<32x256xf32>
    %79 = tpu.matmul %78, %77, %cst_15 {dimension_numbers = #tpu.dot_dimension_numbers<[1], [0], [0], [1], [0, 0, 1, 1], [], []>} : vector<32x4xf32>, vector<4x256xf32>, vector<32x256xf32> -> vector<32x256xf32>
    %80 = arith.addf %71, %79 : vector<32x256xf32>
    %c0_16 = arith.constant 0 : index
    %c0_17 = arith.constant 0 : index
    %c0_18 = arith.constant 0 : index
    %81 = vector.load %arg4[%c0_16, %c0_17, %c0_18] : memref<1x32x1xf32, #tpu.memory_space<vmem>>, vector<1x32x1xf32>
    %82 = vector.shape_cast %81 : vector<1x32x1xf32> to vector<32x1xf32>
    %83 = vector.broadcast %82 : vector<32x1xf32> to vector<32x256xf32>
    %84 = arith.addf %80, %83 : vector<32x256xf32>
    %cst_19 = arith.constant 0.000000e+00 : f32
    %85 = vector.broadcast %cst_19 : f32 to vector<32x256xf32>
    %86 = arith.cmpf ogt, %84, %85 : vector<32x256xf32>
    %cst_20 = arith.constant 0.00999999977 : f32
    %87 = vector.broadcast %cst_20 : f32 to vector<32x256xf32>
    %88 = arith.mulf %87, %84 : vector<32x256xf32>
    %89 = arith.select %86, %84, %88 : vector<32x256xi1>, vector<32x256xf32>
    %c0_21 = arith.constant 0 : index
    %c0_22 = arith.constant 0 : index
    %c0_23 = arith.constant 0 : index
    %90 = vector.load %arg5[%c0_21, %c0_22, %c0_23] : memref<1x32x256xf32, #tpu.memory_space<vmem>>, vector<1x32x256xf32>
    %91 = vector.shape_cast %90 : vector<1x32x256xf32> to vector<32x256xf32>
    %92 = vector.shape_cast %89 : vector<32x256xf32> to vector<1x32x256xf32>
    tpu.vector_store %arg5[%c0_21, %c0_22, %c0_23], %92 {strides = array<i32>} : memref<1x32x256xf32, #tpu.memory_space<vmem>>, vector<1x32x256xf32>,
    return
  }
  func.func @transform_0(%arg0: i32) -> (i32, i32, i32) {
    %c0_i32 = arith.constant 0 : i32
    %c0_i32_0 = arith.constant 0 : i32
    %c0_i32_1 = arith.constant 0 : i32
    return %arg0, %c0_i32, %c0_i32_0 : i32, i32, i32
  }
  func.func @transform_1(%arg0: i32) -> (i32, i32) {
    %c0_i32 = arith.constant 0 : i32
    %c0_i32_0 = arith.constant 0 : i32
    %c0_i32_1 = arith.constant 0 : i32
    return %c0_i32, %c0_i32_0 : i32, i32
  }
  func.func @transform_2(%arg0: i32) -> (i32, i32, i32) {
    %c0_i32 = arith.constant 0 : i32
    %c0_i32_0 = arith.constant 0 : i32
    %c0_i32_1 = arith.constant 0 : i32
    return %arg0, %c0_i32, %c0_i32_0 : i32, i32, i32
  }
  func.func @transform_3(%arg0: i32) -> (i32, i32, i32) {
    %c0_i32 = arith.constant 0 : i32
    %c0_i32_0 = arith.constant 0 : i32
    %c0_i32_1 = arith.constant 0 : i32
    return %arg0, %c0_i32, %c0_i32_0 : i32, i32, i32
  }
  func.func @transform_4(%arg0: i32) -> (i32, i32, i32) {
    %c0_i32 = arith.constant 0 : i32
    %c0_i32_0 = arith.constant 0 : i32
    %c0_i32_1 = arith.constant 0 : i32
    return %arg0, %c0_i32, %c0_i32_0 : i32, i32, i32
  }
}

</mosaic_0001>

<bundles_post_ra>
// kernel: tpu_custom_call.1
= control target key start
LH: loop header
LB: loop body
LE: loop exit
PB: predicated region body
PF: predicated region fallthrough
CT: control target
= control target key end

     0   :  { %9 = vsyncpa [#allocation3], 0  ;;  %s2202_s0 = inlined_call_operand.hbm [shape: f32[2,4,256], index: 0, kind: input, shape index: {}]   ;;  %s2203_s1 = inlined_call_operand.hbm [shape: f32[9,256], index: 1, kind: input, shape index: {}]   ;;  %s2204_s2 = inlined_call_operand.vmem [shape: f32[2,32,36], index: 2, kind: input, shape index: {}]   ;;  %s2205_s3 = inlined_call_operand.vmem [shape: f32[2,32,1], index: 3, kind: input, shape index: {}]   ;;  %s2206_s4 = inlined_call_operand.hbm [shape: f32[2,32,256], index: 4, kind: output, shape index: {}]  }
   0x1   :  { %11 = vsyncpa [#allocation3 + $0x1], 0 }
   0x2   :  { %12 = vsyncpa [#allocation6], 0 }
   0x3   :  { %13 = vsyncpa [#allocation4], 0 }
   0x4   :  { %15 = vsyncpa [#allocation4 + $0x1], 0  ;;  %s1787_s15 = smov 0   ;;  %s1789_s16 = smov 0  }
   0x5   :  { %s1791_s17 = smov 0   ;;  %s1793_s18 = smov 0  }
   0x6 LB: > { %s162_s21 = sshll.u32 %s2203_s1, 4  ;;  %s1811_s22 = sadd.s32 4294967295, %s1740_s18   ;;  %s1740_s18 = sphi %s1793_s18, %s2216_s18   ;;  %s1736_s17 = sphi %s1791_s17, %s2215_s17   ;;  %s1732_s16 = sphi %s1789_s16, %s2214_s16   ;;  %s1728_s15 = sphi %s1787_s15, %s2213_s15   ;;  %s163_s21 = int_to_ptr.hbm [resolvable:$true] %s162_s21 }
   0x7   : > { %p1414_p0 = scmp.ge.s32.totalorder %s1740_s18, 1  ;;  %p42_p1 = scmp.eq.s32.totalorder %s1811_s22, 0 }
   0x8   : > { %p151_p2 = scmp.lt.s32.totalorder %s1740_s18, 3  ;;  %s1742_s24 = smov [#allocation5]  }
   0x9   : > { %s164_s25 = sshll.u32 %s1742_s24, 4  ;;  %s1743_s26 = smov 256   ;;  %s165_s25 = int_to_ptr.vmem [resolvable:$true] %s164_s25 }
   0xa   : > { %p1816_p3 = pnand %p1414_p0, %p151_p2  ;;  %s1744_s27 = smov 16  }
   0xb   : > { %s1413_s28 = sadd.s32 4294967294, %s1740_s18   ;;  %s1827_s29 = sadd.s32 1, %s1740_s18  }
   0xc   : > { %p1537_p4 = pneg %p1816_p3  ;;  %s28_s30 = sadd.s32 1, %s1736_s17 }
   0xd   : > { %s25_s5 = ssub.s32 %s1740_s18, %s1827_s29  ;;  %p35_p7 = scmp.ne.s32.totalorder %s1736_s17, %s1732_s16 }
   0xe   : > { %p1538_p6 = pnand %p1537_p4, %p42_p1  ;;  %p26_p8 = scmp.eq.s32.totalorder %s25_s5, 0 }
   0xf   : > { %p36_p9 = scmp.eq.s32.totalorder %s1740_s18, 0  ;;  %p41_p10 = scmp.ne.s32.totalorder %s1732_s16, %s1728_s15 }
  0x10   : > { %1540 = dma.hbm_to_vmem [thread:$0]  (!%p1538_p6), %s163_s21, 512, %s165_s25, [#allocation6], %s1743_s26, %s1743_s26, %s1744_s27  }
  0x11   : > { %p138_p11 = scmp.eq.s32.totalorder %s1811_s22, 1  ;;  %p1843_p12 = por %p42_p1, %p41_p10 }
  0x12   : > { %s1839_s6 = scalar_select %p26_p8, %s1736_s17, %s28_s30  }
  0x13   : > { %p1847_p13 = por %p138_p11, %p35_p7  ;;  %p144_p0 = scmp.eq.s32.totalorder %s1413_s28, 1 }
  0x14   : > { %p37_p2 = por %p36_p9, %p35_p7  ;;  %s178_s9 = sand.u32 1, %s1736_s17  }
  0x15   : > { %p1852_p4 = por %p144_p0, %p41_p10  ;;  %p1550_p6 = scmp.lt.s32.totalorder %s1740_s18, 2 }
  0x16   : > { %s1417_s11 = sshll.u32 %s178_s9, 3  ;;  %s1523_s12 = sshll.u32 %s1740_s18, 3 }
  0x17   : > { %s187_s19 = scalar_lea.hbm %s2202_s0, %s1523_s12  ;;  %s182_s21 = scalar_lea.vmem [#allocation2], %s1417_s11 }
  0x18   : > { %s189_s20 = sshll.u32 %s187_s19, 4  ;;  %s191_s24 = sshll.u32 %s182_s21, 4  ;;  %s190_s20 = int_to_ptr.hbm [resolvable:$true] %s189_s20  ;;  %s192_s24 = int_to_ptr.vmem [resolvable:$true] %s191_s24 }
  0x19   : > { %p1861_p8 = pnand %p1550_p6, %p37_p2  ;;  %s179_s26 = scalar_lea.sflag [#allocation3], %s178_s9 }
  0x1a   : > { %s1640_s27 = sshra.s32 %s190_s20, 4  ;;  %s1647_s11 = scalar_lea.hbm %s2202_s0, 16  ;;  %s1641_s27 = int_to_ptr.hbm [resolvable:$true] %s1640_s27 }
  0x1b   : > { %s1642_s28 = scalar_lea.hbm %s1641_s27, 8  ;;  %p1644_p9 = pneg %p1861_p8 }
  0x1c   : > { %p1643_p7 = scmp.ne.s32.totalorder %s1641_s27, %s1642_s28  ;;  %p1648_p0 = scmp.lt.s32.totalorder %s1641_s27, %s2202_s0 }
  0x1d   : > { %p1649_p2 = scmp.lt.s32.totalorder %s1647_s11, %s1642_s28 }
  0x1e   : > { %p1645_p10 = pnand %p1644_p9, %p1643_p7 }
  0x1f   : > { %p1650_p6 = por %p1649_p2, %p1648_p0 }
  0x20   : > { %p1646_p11 = pneg %p1645_p10 }
  0x22   : > { %p1651_p5 = pnand %p1650_p6, %p1646_p11 }
  0x24   : > { %1654 = shalt.err (!%p1651_p5)
}
  0x25   : > { %1544 = dma.hbm_to_vmem [thread:$0]  (!%p1861_p8), %s190_s20, 128, %s192_s24, %s179_s26  }
  0x26   : > { %216 = sbr.rel (%p1816_p3) target bundleno = 486 (0x1e6), region = 36  ;;  %s1878_s9 = sand.u32 (!%p1816_p3), 1, %s1732_s16  }
  0x27   : > { %s1421_s14 = sshll.u32 (!%p1816_p3), %s1878_s9, 3  ;;  %s219_s19 = scalar_lea.sflag (!%p1816_p3), [#allocation3], %s1878_s9 }
  0x28   : > { %s222_s21 = scalar_lea.vmem (!%p1816_p3), [#allocation2], %s1421_s14 }
  0x2b   : > { %1715 = dma.done.wait (%p1843_p12), %s219_s19, 128  }
  0x2c   : > { %1717 = vsyncadd (%p1843_p12), %s219_s19, 4294967168 }
  0x2d   : > { %1719 = dma.done.wait (%p42_p1), [#allocation6], 512  }
  0x2e   : > { %1721 = vsyncadd (%p42_p1), [#allocation6], 4294966784  ;;  %v1890_v0 = vld [vmem:[%s222_s21] sm:$0xff]  ;;  %p263_p3 = scmp.lt.s32.totalorder %s1811_s22, 1  ;;  %s1745_s26 = smov 124   ;;  %v1967_v34 = vld [vmem:[#allocation5] sm:$0xff] }
  0x2f   : > { %283 = vst [vmem:[#allocation1] ss:$2 sm:$0xff] %v1890_v0  ;;  %s1746_s27 = smov 16   ;;  %s1747_s28 = smov 17   ;;  %v1969_v35 = vld [vmem:[#allocation5 + $0x8] sm:$0xff]  ;;  %vm316_vm0 = vcmask 130048  }
  0x30   : > { %s1896_s23 = scalar_select %p263_p3, %s1811_s22, 1  ;;  %v321_v37 = vperm.slane %v1967_v34, 1  ;;  %v322_v38 = vperm.slane %v1969_v35, 1  ;;  %vm346_vm1 = vcmask 1043456   ;;  %vm337_vm2 = vcmask 31744  }
  0x31   : > { %s1748_s30 = smov 15   ;;  %s1749_s5 = smov 120   ;;  %vm295_vm3 = vcmask 138240   ;;  %v300_v49 = vperm.slane %v1967_v34, 0  ;;  %v301_v50 = vperm.slane %v1969_v35, 0  ;;  %vm495_vm4 = vcmask 121856  }
  0x32   : > { %s1524_s7 = sshll.u32 %s1896_s23, 5  ;;  %s1750_s11 = smov 116   ;;  %v500_v58 = vperm.slane %v1967_v34, 2  ;;  %v501_v59 = vperm.slane %v1969_v35, 2  ;;  %vm604_vm5 = vcmask 7168   ;;  %vm797_vm6 = vcmask 1039360  }
  0x33   : > { %s267_s25 = scalar_lea.vmem %s2204_s2, %s1524_s7  ;;  %s1751_s12 = smov 1   ;;  %vm906_vm7 = vcmask 924672   ;;  %vm1015_vm8 = vcmask 916480   ;;  %vm1124_vm9 = vcmask 908288  }
  0x34   : > { %v1905_v4 = vld [vmem:[%s267_s25] sm:$0xff]  ;;  %v1910_v6 = vld [vmem:[%s267_s25 + $0x18] sm:$0xff]  ;;  %v1916_v9 = vld [vmem:[%s267_s25 + $0x10] sm:$0xff]  ;;  %s1752_s13 = smov 112   ;;  %s1753_s14 = smov 108  }
  0x35   : > { %329 = vrot.lane.b32.xlu2 %v1905_v4, %s1745_s26  ;;  %v1920_v11 = vld [vmem:[%s267_s25 + $0x8] sm:$0xff]  ;;  %s1754_s19 = smov 104   ;;  %s1755_s21 = smov 127  }
  0x36   : > { %v284_v1 = vld.sshfl [vmem:[#allocation1 + $0x8] sm:$0xff pattern:$0x75316420]  ;;  %s1756_s20 = smov 113   ;;  %s1757_s24 = smov 100  }
  0x37   : > { %288 = vst [vmem:[#allocation1] ss:$2 sm:$0xff] %v1890_v0  ;;  %s1758_s25 = smov 111   ;;  %s1423_s23 = sshll.u32 %s1878_s9, 6 }
  0x3d   : > { %335 = vrot.lane.b32.xlu2 %v1910_v6, %s1745_s26 }
  0x3e   : > { %v289_v2 = vld.sshfl [vmem:[#allocation1] sm:$0xff pattern:$0x75316420]  ;;  %v290_v3 = vld.sshfl [vmem:[#allocation1 + $0x8] sm:$0xff pattern:$0x75316420] }
  0x3f   : > { %304 = vst [vmem:[#allocation1] ss:$2 sm:$0xff] %v1890_v0 }
  0x45   : > { %293 = vrot.lane.b32.xlu2 %v290_v3, %s1747_s28 }
  0x46   : > { %v305_v5 = vld.sshfl [vmem:[#allocation1 + $0x8] sm:$0xff pattern:$0x75316420] }
  0x47   : > { %306 = vrot.lane.b32.xlu0 %v305_v5, %s1746_s27  ;;  %309 = vst [vmem:[#allocation1] ss:$2 sm:$0xff] %v1890_v0 }
  0x4e   : > { %v311_v7 = vld.sshfl [vmem:[#allocation1 + $0x8] sm:$0xff pattern:$0x75316420]  ;;  %v310_v8 = vld.sshfl [vmem:[#allocation1] sm:$0xff pattern:$0x75316420] }
  0x4f   : > { %314 = vrot.lane.b32.xlu1 %v311_v7, %s1746_s27  ;;  %312 = vrot.lane.b32.xlu0 %v310_v8, %s1746_s27  ;;  %483 = vst [vmem:[#allocation1] ss:$2 sm:$0xff] %v1890_v0 }
  0x56   : > { %v484_v10 = vld.sshfl [vmem:[#allocation1 + $0x8] sm:$0xff pattern:$0x75316420] }
  0x57   : > { %333 = vrot.lane.b32.xlu1 %v1916_v9, %s1745_s26  ;;  %285 = vrot.lane.b32.xlu0 %v284_v1, %s1747_s28  ;;  %488 = vst [vmem:[#allocation1] ss:$2 sm:$0xff] %v1890_v0 }
  0x5e   : > { %v490_v12 = vld.sshfl [vmem:[#allocation1 + $0x8] sm:$0xff pattern:$0x75316420]  ;;  %v489_v13 = vld.sshfl [vmem:[#allocation1] sm:$0xff pattern:$0x75316420] }
  0x5f   : > { %291 = vrot.lane.b32.xlu1 %v289_v2, %s1747_s28  ;;  %331 = vrot.lane.b32.xlu0 %v1920_v11, %s1745_s26  ;;  %592 = vst [vmem:[#allocation1] ss:$2 sm:$0xff] %v1890_v0  ;;  %s1759_s26 = smov 96   ;;  %s1690_s28 = scalar_lea.hbm %s2206_s4, 128 }
  0x60   : > { %491 = vrot.lane.b32.xlu2 %v489_v13, %s1748_s30 }
  0x66   : > { %v593_v14 = vld.sshfl [vmem:[#allocation1 + $0x8] sm:$0xff pattern:$0x75316420] }
  0x67   : > { %485 = vrot.lane.b32.xlu1 %v484_v10, %s1748_s30  ;;  %493 = vrot.lane.b32.xlu0 %v490_v12, %s1748_s30  ;;  %597 = vst [vmem:[#allocation1] ss:$2 sm:$0xff] %v1890_v0  ;;  %v609_v12 = vperm.slane %v1967_v34, 3 }
  0x68   : > { %506 = vrot.lane.b32.xlu2 %v1920_v11, %s1749_s5 }
  0x6e   : > { %v599_v15 = vld.sshfl [vmem:[#allocation1 + $0x8] sm:$0xff pattern:$0x75316420]  ;;  %v598_v16 = vld.sshfl [vmem:[#allocation1] sm:$0xff pattern:$0x75316420] }
  0x6f   : > { %504 = vrot.lane.b32.xlu1 %v1905_v4, %s1749_s5  ;;  %508 = vrot.lane.b32.xlu0 %v1916_v9, %s1749_s5  ;;  %709 = vst [vmem:[#allocation1] ss:$2 sm:$0xff] %v1890_v0 }
  0x70   : > { %613 = vrot.lane.b32.xlu2 %v1905_v4, %s1750_s11 }
  0x76   : > { %v1930_v17 = vld.sshfl [vmem:[#allocation1] sm:$0xff pattern:$0x75316420]  ;;  %v1932_v18 = vld.sshfl [vmem:[#allocation1 + $0x8] sm:$0xff pattern:$0x75316420] }
  0x77   : > { %510 = vrot.lane.b32.xlu1 %v1910_v6, %s1749_s5  ;;  %615 = vrot.lane.b32.xlu0 %v1920_v11, %s1750_s11  ;;  %790 = vst [vmem:[#allocation1] ss:$2 sm:$0xff] %v1890_v0  ;;  %s2092_s5 = scalar_lea.vmem %s2205_s3, %s1524_s7  ;;  %s2147_s7 = scalar_lea.vmem [#allocation7], %s1423_s23 }
  0x78   : > { %600 = vrot.lane.b32.xlu2 %v598_v16, %s1751_s12 }
  0x7e   : > { %v792_v19 = vld.sshfl [vmem:[#allocation1 + $0x8] sm:$0xff pattern:$0x75316420]  ;;  %v791_v20 = vld.sshfl [vmem:[#allocation1] sm:$0xff pattern:$0x75316420] }
  0x7f   : > { %594 = vrot.lane.b32.xlu1 %v593_v14, %s1751_s12  ;;  %602 = vrot.lane.b32.xlu0 %v599_v15, %s1751_s12  ;;  %801 = vst [vmem:[#allocation1] ss:$2 sm:$0xff] %v1890_v0 }
  0x80   : > { %617 = vrot.lane.b32.xlu2 %v1916_v9, %s1750_s11 }
  0x86   : > { %v802_v21 = vld.sshfl [vmem:[#allocation1] sm:$0xff pattern:$0x75316420] }
  0x87   : > { %701 = vrot.lane.b32.xlu1 %v1905_v4, %s1752_s13  ;;  %703 = vrot.lane.b32.xlu0 %v1920_v11, %s1752_s13  ;;  %899 = vst [vmem:[#allocation1] ss:$2 sm:$0xff] %v1890_v0 }
  0x88   : > { %705 = vrot.lane.b32.xlu2 %v1916_v9, %s1752_s13 }
  0x8e   : > { %v900_v22 = vld.sshfl [vmem:[#allocation1] sm:$0xff pattern:$0x75316420]  ;;  %v901_v23 = vld.sshfl [vmem:[#allocation1 + $0x8] sm:$0xff pattern:$0x75316420] }
  0x8f   : > { %619 = vrot.lane.b32.xlu1 %v1910_v6, %s1750_s11  ;;  %707 = vrot.lane.b32.xlu0 %v1910_v6, %s1752_s13  ;;  %910 = vst [vmem:[#allocation1] ss:$2 sm:$0xff] %v1890_v0  ;;  %v330_v27 = vpop.permute.xlu2 %329  ;;  %s1526_s11 = sshll.u32 %s1811_s22, 6 }
  0x90   : > { %813 = vrot.lane.b32.xlu2 %v1920_v11, %s1753_s14 }
  0x96   : > { %v911_v24 = vld.sshfl [vmem:[#allocation1] sm:$0xff pattern:$0x75316420] }
  0x97   : > { %811 = vrot.lane.b32.xlu1 %v1905_v4, %s1753_s14  ;;  %920 = vrot.lane.b32.xlu0 %v1905_v4, %s1754_s19  ;;  %1008 = vst [vmem:[#allocation1] ss:$2 sm:$0xff] %v1890_v0  ;;  %v1957_v29 = vpop.permute.xlu2 %335 }
  0x98   : > { %803 = vrot.lane.b32.xlu2 %v802_v21, %s1755_s21 }
  0x9e   : > { %v1009_v25 = vld.sshfl [vmem:[#allocation1] sm:$0xff pattern:$0x75316420]  ;;  %v1010_v26 = vld.sshfl [vmem:[#allocation1 + $0x8] sm:$0xff pattern:$0x75316420] }
  0x9f   : > { %795 = vrot.lane.b32.xlu1 %v792_v19, %s1755_s21  ;;  %793 = vrot.lane.b32.xlu0 %v791_v20, %s1755_s21  ;;  %1019 = vst [vmem:[#allocation1] ss:$2 sm:$0xff] %v1890_v0  ;;  %v294_v32 = vpop.permute.xlu2 %293  ;;  %s1291_s21 = scalar_lea.sflag [#allocation4], %s1878_s9 }
  0xa0   : > { %902 = vrot.lane.b32.xlu2 %v900_v22, %s1756_s20 }
  0xa6   : > { %v1020_v28 = vld.sshfl [vmem:[#allocation1] sm:$0xff pattern:$0x75316420] }
  0xa7   : > { %904 = vrot.lane.b32.xlu0 %v901_v23, %s1756_s20  ;;  %912 = vrot.lane.b32.xlu1 %v911_v24, %s1756_s20  ;;  %1117 = vst [vmem:[#allocation1] ss:$2 sm:$0xff] %v1890_v0 }
  0xa8   : > { %922 = vrot.lane.b32.xlu2 %v1920_v11, %s1754_s19 }
  0xae   : > { %v1119_v30 = vld.sshfl [vmem:[#allocation1 + $0x8] sm:$0xff pattern:$0x75316420]  ;;  %v1118_v31 = vld.sshfl [vmem:[#allocation1] sm:$0xff pattern:$0x75316420] }
  0xaf   : > { %817 = vrot.lane.b32.xlu0 %v1910_v6, %s1753_s14  ;;  %815 = vrot.lane.b32.xlu1 %v1916_v9, %s1753_s14  ;;  %1128 = vst [vmem:[#allocation1] ss:$2 sm:$0xff] %v1890_v0  ;;  %s1302_s14 = scalar_lea.hbm %s2206_s4, %s1526_s11 }
  0xb0   : > { %926 = vrot.lane.b32.xlu2 %v1910_v6, %s1754_s19  ;;  %s1305_s22 = sshll.u32 %s1302_s14, 4  ;;  %s1306_s22 = int_to_ptr.hbm [resolvable:$true] %s1305_s22 }
  0xb1   : > { %s1684_s20 = sshra.s32 %s1306_s22, 4  ;;  %s1685_s20 = int_to_ptr.hbm [resolvable:$true] %s1684_s20 }
  0xb2   : > { %p1691_p8 = scmp.lt.s32.totalorder %s1685_s20, %s2206_s4 }
  0xb6   : > { %v1129_v45 = vld.sshfl [vmem:[#allocation1] sm:$0xff pattern:$0x75316420] }
  0xb7   : > { %1029 = vrot.lane.b32.xlu0 %v1905_v4, %s1757_s24  ;;  %924 = vrot.lane.b32.xlu1 %v1916_v9, %s1754_s19  ;;  %s1303_s19 = sshll.u32 %s2147_s7, 4  ;;  %s1304_s19 = int_to_ptr.vmem [resolvable:$true] %s1303_s19 }
  0xb8   : > { %1011 = vrot.lane.b32.xlu2 %v1009_v25, %s1752_s13 }
  0xb9   : > { %v307_v33 = vpop.permute.xlu0 %306 }
  0xba   : > { %v492_v36 = vpop.permute.xlu2 %491 }
  0xbf   : > { %1013 = vrot.lane.b32.xlu0 %v1010_v26, %s1752_s13  ;;  %1021 = vrot.lane.b32.xlu1 %v1020_v28, %s1752_s13  ;;  %v807_v26 = vperm.slane %v1967_v34, 5 }
  0xc0   : > { %1122 = vrot.lane.b32.xlu2 %v1119_v30, %s1758_s25 }
  0xc1   : > { %v315_v39 = vpop.permute.xlu1 %314  ;;  %v313_v40 = vpop.permute.xlu0 %312 }
  0xc2   : > { %v317_v41 = vsel %vm316_vm0, %v313_v40, %v315_v39  ;;  %v320_v42 = vsel %vm316_vm0, %v307_v33, %v313_v40  ;;  %v507_v46 = vpop.permute.xlu2 %506 }
  0xc3   : > { %v323_v43 = vmul.f32 %v321_v37, %v320_v42  ;;  %v324_v44 = vmul.f32 %v322_v38, %v317_v41  ;;  %v916_v37 = vperm.slane %v1967_v34, 6  ;;  %v917_v38 = vperm.slane %v1969_v35, 6 }
  0xc5   : > { %1428 = vmatpush.msk.msra.mxu0 %vm346_vm1, %v323_v43  ;;  %1527 = vmatpush.msk.msra.mxu2 %vm346_vm1, %v323_v43 }
  0xc6   : > { %1433 = vmatpush.msk.msra.mxu1 %vm346_vm1, %v324_v44  ;;  %1528 = vmatpush.msk.msra.mxu3 %vm346_vm1, %v324_v44 }
  0xc7   : > { %1429 = vmatmul.msk.f32.vlgmr.msra.gmra.mxu0 %vm337_vm2, %v330_v27  ;;  %1434 = vmatmul.msk.f32.vlgmr.msra.gmra.mxu1 %vm337_vm2, %v330_v27  ;;  %v808_v27 = vperm.slane %v1969_v35, 5 }
  0xc8   : > { %1120 = vrot.lane.b32.xlu1 %v1118_v31, %s1758_s25  ;;  %1130 = vrot.lane.b32.xlu0 %v1129_v45, %s1758_s25 }
  0xc9   : > { %v334_v47 = vpop.permute.xlu1 %333  ;;  %v286_v48 = vpop.permute.xlu0 %285  ;;  %1138 = vrot.lane.b32.xlu2 %v1905_v4, %s1759_s26 }
  0xca   : > { %1431 = vmatmul.msk.f32.vlgmr.msra.gmra.mxu2 %vm337_vm2, %v334_v47  ;;  %1436 = vmatmul.msk.f32.vlgmr.msra.gmra.mxu3 %vm337_vm2, %v334_v47  ;;  %v1991_v51 = vpop.permute.xlu2 %613 }
  0xd0   : > { %1031 = vrot.lane.b32.xlu1 %v1920_v11, %s1757_s24  ;;  %1033 = vrot.lane.b32.xlu0 %v1916_v9, %s1757_s24 }
  0xd1   : > { %v292_v52 = vpop.permute.xlu1 %291  ;;  %v332_v53 = vpop.permute.xlu0 %331  ;;  %1035 = vrot.lane.b32.xlu2 %v1910_v6, %s1757_s24  ;;  %s1686_s24 = scalar_lea.hbm %s1685_s20, 64 }
  0xd2   : > { %v296_v54 = vsel %vm295_vm3, %v292_v52, %v294_v32  ;;  %v299_v55 = vsel %vm295_vm3, %v286_v48, %v292_v52  ;;  %1430 = vmatmul.msk.f32.gmra.mxu0 %vm337_vm2, %v332_v53  ;;  %1432 = vmatmul.msk.f32.gmra.mxu2 %vm337_vm2, %v1957_v29  ;;  %v601_v0 = vpop.permute.xlu2 %600  ;;  %v1026_v52 = vperm.slane %v1969_v35, 7  ;;  %p1687_p1 = scmp.ne.s32.totalorder %s1685_s20, %s1686_s24  ;;  %p1692_p7 = scmp.lt.s32.totalorder %s1690_s28, %s1686_s24 }
  0xd3   : > { %v302_v56 = vmul.f32 %v300_v49, %v299_v55  ;;  %v303_v57 = vmul.f32 %v301_v50, %v296_v54  ;;  %1435 = vmatmul.msk.f32.gmra.mxu1 %vm337_vm2, %v332_v53  ;;  %1437 = vmatmul.msk.f32.gmra.mxu3 %vm337_vm2, %v1957_v29 }
  0xd4   : > { %p1688_p5 = pnand %p1687_p1, %p1847_p13  ;;  %p1693_p9 = por %p1692_p7, %p1691_p8 }
  0xd5   : > { %1438 = vmatpush.msk.msrb.mxu2 %vm346_vm1, %v302_v56  ;;  %1443 = vmatpush.msk.msrb.mxu3 %vm346_vm1, %v303_v57 }
  0xd6   : > { %p1689_p12 = pneg %p1688_p5 }
  0xd8   : > { %1140 = vrot.lane.b32.xlu1 %v1920_v11, %s1759_s26  ;;  %1142 = vrot.lane.b32.xlu0 %v1916_v9, %s1759_s26  ;;  %p1694_p10 = pnand %p1693_p9, %p1689_p12 }
  0xd9   : > { %v486_v60 = vpop.permute.xlu1 %485  ;;  %v494_v61 = vpop.permute.xlu0 %493 }
  0xda   : > { %v496_v62 = vsel %vm495_vm4, %v492_v36, %v494_v61  ;;  %v499_v63 = vsel %vm495_vm4, %v486_v60, %v492_v36  ;;  %1439 = vmatmul.msk.f32.vlgmr.msrb.gmra.mxu2 %vm337_vm2, %v1905_v4  ;;  %v1608_v60 = vld [vmem:[#allocation5 + $0x10] ss:$0 sm:$0xff]  ;;  %v1609_v61 = vld [vmem:[#allocation5 + $0x18] ss:$0 sm:$0xff] }
  0xdb   : > { %v502_v1 = vmul.f32 %v500_v58, %v499_v63  ;;  %v503_v2 = vmul.f32 %v501_v59, %v496_v62  ;;  %1444 = vmatmul.msk.f32.vlgmr.msrb.gmra.mxu3 %vm337_vm2, %v1905_v4  ;;  %v618_v4 = vpop.permute.xlu2 %617  ;;  %v1760_v59 = vmov 0  }
  0xdc   : > { %1606 = vset.pattern.permute.xlu0 %v1760_v59  ;;  %1607 = vset.pattern.permute.xlu1 %v1760_v59 }
  0xdd   : > { %1448 = vmatpush.msk.msrb.mxu0 %vm346_vm1, %v502_v1  ;;  %1453 = vmatpush.msk.msrb.mxu1 %vm346_vm1, %v503_v2 }
  0xde   : > { %1605 = vset.pattern.permute.xlu2 %v1760_v59 }
  0xdf   : > { %1468 = vmatpush.msk.msra.mxu0 %vm346_vm1, %v1930_v17  ;;  %1473 = vmatpush.msk.msra.mxu1 %vm346_vm1, %v1932_v18 }
  0xe0   : > { %1144 = vrot.lane.b32.xlu1 %v1910_v6, %s1759_s26 }
  0xe1   : > { %v505_v3 = vpop.permute.xlu1 %504  ;;  %v509_v5 = vpop.permute.xlu0 %508 }
  0xe2   : > { %1440 = vmatmul.msk.f32.gmra.mxu2 %vm337_vm2, %v1920_v11  ;;  %1449 = vmatmul.msk.f32.vlgmr.msrb.gmra.mxu0 %vm337_vm2, %v505_v3 }
  0xe3   : > { %1445 = vmatmul.msk.f32.gmra.mxu3 %vm337_vm2, %v1920_v11  ;;  %1454 = vmatmul.msk.f32.vlgmr.msrb.gmra.mxu1 %vm337_vm2, %v505_v3  ;;  %v706_v10 = vpop.permute.xlu2 %705  ;;  %v610_v11 = vperm.slane %v1969_v35, 3  ;;  %v1227_v35 = vld [vmem:[%s2092_s5 + $0x8] sm:$0xff] }
  0xe4   : > { %1237 = vperm.xlu0 %1606, %v1227_v35  }
  0xe9   : > { %v511_v7 = vpop.permute.xlu1 %510  ;;  %v616_v8 = vpop.permute.xlu0 %615 }
  0xea   : > { %1441 = vmatmul.msk.f32.gmra.mxu2 %vm337_vm2, %v1916_v9  ;;  %1450 = vmatmul.msk.f32.gmra.mxu0 %vm337_vm2, %v507_v46 }
  0xeb   : > { %1446 = vmatmul.msk.f32.gmra.mxu3 %vm337_vm2, %v1916_v9  ;;  %1455 = vmatmul.msk.f32.gmra.mxu1 %vm337_vm2, %v507_v46  ;;  %v814_v9 = vpop.permute.xlu2 %813 }
  0xf1   : > { %v595_v13 = vpop.permute.xlu1 %594  ;;  %v603_v14 = vpop.permute.xlu0 %602 }
  0xf2   : > { %v605_v15 = vsel %vm604_vm5, %v601_v0, %v603_v14  ;;  %v608_v16 = vsel %vm604_vm5, %v595_v13, %v601_v0  ;;  %1442 = vmatmul.msk.f32.gmra.mxu2 %vm337_vm2, %v1910_v6  ;;  %1451 = vmatmul.msk.f32.gmra.mxu0 %vm337_vm2, %v509_v5 }
  0xf3   : > { %v611_v17 = vmul.f32 %v609_v12, %v608_v16  ;;  %v612_v18 = vmul.f32 %v610_v11, %v605_v15  ;;  %1447 = vmatmul.msk.f32.gmra.mxu3 %vm337_vm2, %v1910_v6  ;;  %1456 = vmatmul.msk.f32.gmra.mxu1 %vm337_vm2, %v509_v5  ;;  %v804_v22 = vpop.permute.xlu2 %803 }
  0xf5   : > { %1458 = vmatpush.msk.msra.mxu2 %vm346_vm1, %v611_v17  ;;  %1463 = vmatpush.msk.msra.mxu3 %vm346_vm1, %v612_v18 }
  0xf9   : > { %v702_v19 = vpop.permute.xlu1 %701  ;;  %v704_v20 = vpop.permute.xlu0 %703 }
  0xfa   : > { %1452 = vmatmul.msk.f32.gmra.mxu0 %vm337_vm2, %v511_v7  ;;  %1459 = vmatmul.msk.f32.vlgmr.msra.gmra.mxu2 %vm337_vm2, %v1991_v51 }
  0xfb   : > { %1457 = vmatmul.msk.f32.gmra.mxu1 %vm337_vm2, %v511_v7  ;;  %1464 = vmatmul.msk.f32.vlgmr.msra.gmra.mxu3 %vm337_vm2, %v1991_v51  ;;  %v903_v25 = vpop.permute.xlu2 %902  ;;  %v1025_v51 = vperm.slane %v1967_v34, 7 }
 0x101   : > { %v620_v6 = vpop.permute.xlu1 %619  ;;  %v708_v21 = vpop.permute.xlu0 %707 }
 0x102   : > { %1460 = vmatmul.msk.f32.gmra.mxu2 %vm337_vm2, %v616_v8  ;;  %1469 = vmatmul.msk.f32.vlgmr.msra.gmra.mxu0 %vm337_vm2, %v702_v19 }
 0x103   : > { %1465 = vmatmul.msk.f32.gmra.mxu3 %vm337_vm2, %v616_v8  ;;  %1474 = vmatmul.msk.f32.vlgmr.msra.gmra.mxu1 %vm337_vm2, %v702_v19  ;;  %v923_v36 = vpop.permute.xlu2 %922 }
 0x109   : > { %v812_v23 = vpop.permute.xlu1 %811  ;;  %v921_v24 = vpop.permute.xlu0 %920 }
 0x10a   : > { %1461 = vmatmul.msk.f32.gmra.mxu2 %vm337_vm2, %v618_v4  ;;  %1470 = vmatmul.msk.f32.gmra.mxu0 %vm337_vm2, %v704_v20 }
 0x10b   : > { %1466 = vmatmul.msk.f32.gmra.mxu3 %vm337_vm2, %v618_v4  ;;  %1475 = vmatmul.msk.f32.gmra.mxu1 %vm337_vm2, %v704_v20  ;;  %v927_v45 = vpop.permute.xlu2 %926  ;;  %v1228_v4 = vld [vmem:[%s2092_s5 + $0x10] sm:$0xff] }
 0x10c   : > { %1242 = vperm.xlu1 %1607, %v1228_v4  }
 0x111   : > { %v796_v28 = vpop.permute.xlu1 %795  ;;  %v794_v29 = vpop.permute.xlu0 %793 }
 0x112   : > { %v798_v30 = vsel %vm797_vm6, %v794_v29, %v796_v28  ;;  %v806_v31 = vsel %vm797_vm6, %v796_v28, %v804_v22  ;;  %1462 = vmatmul.msk.f32.gmra.mxu2 %vm337_vm2, %v620_v6  ;;  %1471 = vmatmul.msk.f32.gmra.mxu0 %vm337_vm2, %v706_v10 }
 0x113   : > { %v809_v32 = vmul.f32 %v807_v26, %v798_v30  ;;  %v810_v33 = vmul.f32 %v808_v27, %v806_v31  ;;  %1467 = vmatmul.msk.f32.gmra.mxu3 %vm337_vm2, %v620_v6  ;;  %1476 = vmatmul.msk.f32.gmra.mxu1 %vm337_vm2, %v706_v10  ;;  %v1012_v50 = vpop.permute.xlu2 %1011  ;;  %v1226_v10 = vld [vmem:[%s2092_s5] sm:$0xff]  ;;  %v1229_v6 = vld [vmem:[%s2092_s5 + $0x18] sm:$0xff] }
 0x114   : > { %1232 = vperm.xlu2 %1605, %v1226_v10  }
 0x115   : > { %1478 = vmatpush.msk.msrb.mxu2 %vm346_vm1, %v809_v32  ;;  %1483 = vmatpush.msk.msrb.mxu3 %vm346_vm1, %v810_v33 }
 0x119   : > { %v905_v39 = vpop.permute.xlu0 %904  ;;  %v913_v40 = vpop.permute.xlu1 %912 }
 0x11a   : > { %v907_v41 = vsel %vm906_vm7, %v903_v25, %v905_v39  ;;  %v915_v42 = vsel %vm906_vm7, %v905_v39, %v913_v40  ;;  %1472 = vmatmul.msk.f32.gmra.mxu0 %vm337_vm2, %v708_v21  ;;  %1479 = vmatmul.msk.f32.vlgmr.msrb.gmra.mxu2 %vm337_vm2, %v812_v23 }
 0x11b   : > { %v918_v43 = vmul.f32 %v916_v37, %v907_v41  ;;  %v919_v44 = vmul.f32 %v917_v38, %v915_v42  ;;  %1477 = vmatmul.msk.f32.gmra.mxu1 %vm337_vm2, %v708_v21  ;;  %1484 = vmatmul.msk.f32.vlgmr.msrb.gmra.mxu3 %vm337_vm2, %v812_v23  ;;  %v1123_v34 = vpop.permute.xlu2 %1122 }
 0x11c   : > { %1247 = vperm.xlu2 %1605, %v1229_v6  }
 0x11d   : > { %1488 = vmatpush.msk.msrb.mxu0 %vm346_vm1, %v918_v43  ;;  %1493 = vmatpush.msk.msrb.mxu1 %vm346_vm1, %v919_v44 }
 0x121   : > { %v818_v46 = vpop.permute.xlu0 %817  ;;  %v816_v47 = vpop.permute.xlu1 %815 }
 0x122   : > { %1480 = vmatmul.msk.f32.gmra.mxu2 %vm337_vm2, %v814_v9  ;;  %1489 = vmatmul.msk.f32.vlgmr.msrb.gmra.mxu0 %vm337_vm2, %v921_v24 }
 0x123   : > { %1485 = vmatmul.msk.f32.gmra.mxu3 %vm337_vm2, %v814_v9  ;;  %1494 = vmatmul.msk.f32.vlgmr.msrb.gmra.mxu1 %vm337_vm2, %v921_v24  ;;  %v1139_v5 = vpop.permute.xlu2 %1138 }
 0x129   : > { %v1030_v48 = vpop.permute.xlu0 %1029  ;;  %v925_v49 = vpop.permute.xlu1 %924 }
 0x12a   : > { %1481 = vmatmul.msk.f32.gmra.mxu2 %vm337_vm2, %v816_v47  ;;  %1490 = vmatmul.msk.f32.gmra.mxu0 %vm337_vm2, %v923_v36 }
 0x12b   : > { %1486 = vmatmul.msk.f32.gmra.mxu3 %vm337_vm2, %v816_v47  ;;  %1495 = vmatmul.msk.f32.gmra.mxu1 %vm337_vm2, %v923_v36  ;;  %v1036_v16 = vpop.permute.xlu2 %1035 }
 0x131   : > { %v1014_v53 = vpop.permute.xlu0 %1013  ;;  %v1022_v54 = vpop.permute.xlu1 %1021 }
 0x132   : > { %v1016_v55 = vsel %vm1015_vm8, %v1012_v50, %v1014_v53  ;;  %v1024_v56 = vsel %vm1015_vm8, %v1014_v53, %v1022_v54  ;;  %1482 = vmatmul.msk.f32.gmra.mxu2 %vm337_vm2, %v818_v46  ;;  %1491 = vmatmul.msk.f32.gmra.mxu0 %vm337_vm2, %v925_v49 }
 0x133   : > { %v1027_v57 = vmul.f32 %v1025_v51, %v1016_v55  ;;  %v1028_v58 = vmul.f32 %v1026_v52, %v1024_v56  ;;  %1487 = vmatmul.msk.f32.gmra.mxu3 %vm337_vm2, %v818_v46  ;;  %1496 = vmatmul.msk.f32.gmra.mxu1 %vm337_vm2, %v925_v49 }
 0x135   : > { %1498 = vmatpush.msk.msra.mxu2 %vm346_vm1, %v1027_v57  ;;  %1503 = vmatpush.msk.msra.mxu3 %vm346_vm1, %v1028_v58 }
 0x13a   : > { %v1121_v62 = vpop.permute.xlu1 %1120  ;;  %v1131_v63 = vpop.permute.xlu0 %1130  ;;  %1492 = vmatmul.msk.f32.gmra.mxu0 %vm337_vm2, %v927_v45  ;;  %1499 = vmatmul.msk.f32.vlgmr.msra.gmra.mxu2 %vm337_vm2, %v1030_v48 }
 0x13b   : > { %v1125_v0 = vsel %vm1124_vm9, %v1121_v62, %v1123_v34  ;;  %v1133_v1 = vsel %vm1124_vm9, %v1123_v34, %v1131_v63  ;;  %1497 = vmatmul.msk.f32.gmra.mxu1 %vm337_vm2, %v927_v45  ;;  %1504 = vmatmul.msk.f32.vlgmr.msra.gmra.mxu3 %vm337_vm2, %v1030_v48 }
 0x13c   : > { %v1136_v2 = vmul.f32 %v1608_v60, %v1125_v0  ;;  %v1137_v3 = vmul.f32 %v1609_v61, %v1133_v1 }
 0x13e   : > { %1508 = vmatpush.msk.msra.mxu0 %vm346_vm1, %v1136_v2  ;;  %1513 = vmatpush.msk.msra.mxu1 %vm346_vm1, %v1137_v3 }
 0x142   : > { %v1032_v7 = vpop.permute.xlu1 %1031  ;;  %1509 = vmatmul.msk.f32.vlgmr.msra.gmra.mxu0 %vm337_vm2, %v1139_v5  ;;  %v1034_v8 = vpop.permute.xlu0 %1033 }
 0x143   : > { %1500 = vmatmul.msk.f32.gmra.mxu2 %vm337_vm2, %v1032_v7  ;;  %1505 = vmatmul.msk.f32.gmra.mxu3 %vm337_vm2, %v1032_v7 }
 0x144   : > { %1514 = vmatmul.msk.f32.vlgmr.msra.gmra.mxu1 %vm337_vm2, %v1139_v5  ;;  %v370_v14 = vpop.f32.mrf.mxu0  ;;  %v399_v15 = vpop.f32.mrf.mxu1 }
 0x14a   : > { %v1141_v12 = vpop.permute.xlu1 %1140  ;;  %v1143_v17 = vpop.permute.xlu0 %1142 }
 0x14b   : > { %1501 = vmatmul.msk.f32.gmra.mxu2 %vm337_vm2, %v1034_v8  ;;  %1506 = vmatmul.msk.f32.gmra.mxu3 %vm337_vm2, %v1034_v8 }
 0x14c   : > { %1510 = vmatmul.msk.f32.gmra.mxu0 %vm337_vm2, %v1141_v12  ;;  %1515 = vmatmul.msk.f32.gmra.mxu1 %vm337_vm2, %v1141_v12 }
 0x14d   : > { %v376_v11 = vpop.f32.mrf.mxu2  ;;  %v405_v13 = vpop.f32.mrf.mxu3 }
 0x14f   : > { %v373_v19 = vpop.f32.mrf.mxu0 }
 0x150   : > { %v402_v20 = vpop.f32.mrf.mxu1 }
 0x152   : > { %v1145_v21 = vpop.permute.xlu1 %1144 }
 0x153   : > { %1502 = vmatmul.msk.f32.gmra.mxu2 %vm337_vm2, %v1036_v16  ;;  %1507 = vmatmul.msk.f32.gmra.mxu3 %vm337_vm2, %v1036_v16 }
 0x154   : > { %1511 = vmatmul.msk.f32.gmra.mxu0 %vm337_vm2, %v1143_v17  ;;  %1516 = vmatmul.msk.f32.gmra.mxu1 %vm337_vm2, %v1143_v17 }
 0x155   : > { %v379_v18 = vpop.f32.mrf.mxu2 }
 0x156   : > { %v408_v9 = vpop.f32.mrf.mxu3 }
 0x15c   : > { %1512 = vmatmul.msk.f32.gmra.mxu0 %vm337_vm2, %v1145_v21  ;;  %1517 = vmatmul.msk.f32.gmra.mxu1 %vm337_vm2, %v1145_v21 }
 0x15d   : > { %v442_v22 = vpop.f32.mrf.mxu2 }
 0x15e   : > { %v443_v23 = vadd.f32 %v442_v22, %v370_v14  ;;  %v471_v24 = vpop.f32.mrf.mxu3 }
 0x15f   : > { %v472_v25 = vadd.f32 %v471_v24, %v399_v15  ;;  %v543_v26 = vpop.f32.mrf.mxu0 }
 0x160   : > { %v584_v27 = vadd.f32 %v543_v26, %v443_v23  ;;  %v572_v28 = vpop.f32.mrf.mxu1 }
 0x161   : > { %v585_v29 = vadd.f32 %v572_v28, %v472_v25 }
 0x165   : > { %v445_v30 = vpop.f32.mrf.mxu2 }
 0x166   : > { %v446_v31 = vadd.f32 %v445_v30, %v373_v19  ;;  %v474_v32 = vpop.f32.mrf.mxu3 }
 0x167   : > { %v475_v33 = vadd.f32 %v474_v32, %v402_v20  ;;  %v546_v36 = vpop.f32.mrf.mxu0 }
 0x168   : > { %v586_v37 = vadd.f32 %v546_v36, %v446_v31  ;;  %v575_v38 = vpop.f32.mrf.mxu1 }
 0x169   : > { %v587_v39 = vadd.f32 %v575_v38, %v475_v33 }
 0x16d   : > { %v448_v40 = vpop.f32.mrf.mxu2 }
 0x16e   : > { %v449_v41 = vadd.f32 %v448_v40, %v376_v11  ;;  %v477_v42 = vpop.f32.mrf.mxu3 }
 0x16f   : > { %v478_v43 = vadd.f32 %v477_v42, %v405_v13  ;;  %v549_v44 = vpop.f32.mrf.mxu0 }
 0x170   : > { %v2120_v45 = vadd.f32 %v549_v44, %v449_v41  ;;  %v578_v46 = vpop.f32.mrf.mxu1 }
 0x171   : > { %v2122_v47 = vadd.f32 %v578_v46, %v478_v43  ;;  %v1233_v43 = vpop.permute.xlu2 %1232 }
 0x175   : > { %v451_v48 = vpop.f32.mrf.mxu2 }
 0x176   : > { %v452_v49 = vadd.f32 %v451_v48, %v379_v18  ;;  %v480_v50 = vpop.f32.mrf.mxu3 }
 0x177   : > { %v481_v51 = vadd.f32 %v480_v50, %v408_v9  ;;  %v552_v52 = vpop.f32.mrf.mxu0 }
 0x178   : > { %v2124_v53 = vadd.f32 %v552_v52, %v452_v49  ;;  %v581_v54 = vpop.f32.mrf.mxu1 }
 0x179   : > { %v2126_v55 = vadd.f32 %v581_v54, %v481_v51 }
 0x17d   : > { %v652_v56 = vpop.f32.mrf.mxu2 }
 0x17e   : > { %v681_v57 = vpop.f32.mrf.mxu3  ;;  %v693_v19 = vadd.f32 %v652_v56, %v584_v27 }
 0x17f   : > { %v741_v58 = vpop.f32.mrf.mxu0  ;;  %v694_v20 = vadd.f32 %v681_v57, %v585_v29 }
 0x180   : > { %v770_v34 = vpop.f32.mrf.mxu1  ;;  %v782_v21 = vadd.f32 %v741_v58, %v693_v19 }
 0x181   : > { %v783_v23 = vadd.f32 %v770_v34, %v694_v20 }
 0x185   : > { %v655_v35 = vpop.f32.mrf.mxu2 }
 0x186   : > { %v684_v59 = vpop.f32.mrf.mxu3  ;;  %v695_v30 = vadd.f32 %v655_v35, %v586_v37 }
 0x187   : > { %v744_v60 = vpop.f32.mrf.mxu0  ;;  %v696_v31 = vadd.f32 %v684_v59, %v587_v39 }
 0x188   : > { %v773_v61 = vpop.f32.mrf.mxu1  ;;  %v784_v38 = vadd.f32 %v744_v60, %v695_v30 }
 0x189   : > { %v785_v40 = vadd.f32 %v773_v61, %v696_v31 }
 0x18d   : > { %v658_v62 = vpop.f32.mrf.mxu2 }
 0x18e   : > { %v687_v63 = vpop.f32.mrf.mxu3  ;;  %v697_v37 = vadd.f32 %v658_v62, %v2120_v45 }
 0x18f   : > { %v747_v0 = vpop.f32.mrf.mxu0  ;;  %v698_v39 = vadd.f32 %v687_v63, %v2122_v47  ;;  %v1238_v63 = vpop.permute.xlu0 %1237 }
 0x190   : > { %v776_v1 = vpop.f32.mrf.mxu1  ;;  %v786_v60 = vadd.f32 %v747_v0, %v697_v37 }
 0x191   : > { %v787_v61 = vadd.f32 %v776_v1, %v698_v39 }
 0x195   : > { %v2128_v2 = vpop.f32.mrf.mxu2 }
 0x196   : > { %v2130_v3 = vpop.f32.mrf.mxu3  ;;  %v699_v0 = vadd.f32 %v2128_v2, %v2124_v53 }
 0x197   : > { %v2132_v5 = vpop.f32.mrf.mxu0  ;;  %v700_v1 = vadd.f32 %v2130_v3, %v2126_v55  ;;  %v1243_v3 = vpop.permute.xlu1 %1242 }
 0x198   : > { %v2134_v4 = vpop.f32.mrf.mxu1 }
 0x19d   : > { %v850_v7 = vpop.f32.mrf.mxu2 }
 0x19e   : > { %v879_v8 = vpop.f32.mrf.mxu3  ;;  %v891_v25 = vadd.f32 %v850_v7, %v782_v21 }
 0x19f   : > { %v959_v10 = vpop.f32.mrf.mxu0  ;;  %v892_v28 = vadd.f32 %v879_v8, %v783_v23 }
 0x1a0   : > { %v988_v12 = vpop.f32.mrf.mxu1  ;;  %v1000_v32 = vadd.f32 %v959_v10, %v891_v25  ;;  %v788_v25 = vadd.f32 %v2132_v5, %v699_v0 }
 0x1a1   : > { %v1001_v33 = vadd.f32 %v988_v12, %v892_v28  ;;  %v789_v28 = vadd.f32 %v2134_v4, %v700_v1 }
 0x1a5   : > { %v853_v11 = vpop.f32.mrf.mxu2 }
 0x1a6   : > { %v882_v13 = vpop.f32.mrf.mxu3  ;;  %v893_v46 = vadd.f32 %v853_v11, %v784_v38 }
 0x1a7   : > { %v962_v14 = vpop.f32.mrf.mxu0  ;;  %v894_v48 = vadd.f32 %v882_v13, %v785_v40 }
 0x1a8   : > { %v991_v15 = vpop.f32.mrf.mxu1  ;;  %v1002_v56 = vadd.f32 %v962_v14, %v893_v46 }
 0x1a9   : > { %v1003_v57 = vadd.f32 %v991_v15, %v894_v48 }
 0x1ad   : > { %v856_v16 = vpop.f32.mrf.mxu2 }
 0x1ae   : > { %v885_v17 = vpop.f32.mrf.mxu3  ;;  %v895_v7 = vadd.f32 %v856_v16, %v786_v60 }
 0x1af   : > { %v965_v18 = vpop.f32.mrf.mxu0  ;;  %v896_v8 = vadd.f32 %v885_v17, %v787_v61 }
 0x1b0   : > { %v994_v9 = vpop.f32.mrf.mxu1  ;;  %v1004_v19 = vadd.f32 %v965_v18, %v895_v7 }
 0x1b1   : > { %v1005_v20 = vadd.f32 %v994_v9, %v896_v8 }
 0x1b5   : > { %v2136_v6 = vpop.f32.mrf.mxu2 }
 0x1b6   : > { %v2138_v22 = vpop.f32.mrf.mxu3  ;;  %v897_v18 = vadd.f32 %v2136_v6, %v788_v25 }
 0x1b7   : > { %v2140_v24 = vpop.f32.mrf.mxu0  ;;  %v898_v9 = vadd.f32 %v2138_v22, %v789_v28 }
 0x1b8   : > { %v2142_v26 = vpop.f32.mrf.mxu1  ;;  %v1006_v4 = vadd.f32 %v2140_v24, %v897_v18 }
 0x1bd   : > { %v1068_v36 = vpop.f32.mrf.mxu2 }
 0x1be   : > { %v1109_v27 = vadd.f32 %v1068_v36, %v1000_v32  ;;  %v1097_v29 = vpop.f32.mrf.mxu3 }
 0x1bf   : > { %v1110_v41 = vadd.f32 %v1097_v29, %v1001_v33  ;;  %v1177_v42 = vpop.f32.mrf.mxu0  ;;  %v1007_v29 = vadd.f32 %v2142_v26, %v898_v9  ;;  %v1248_v26 = vpop.permute.xlu2 %1247 }
 0x1c0   : > { %v1218_v44 = vadd.f32 %v1177_v42, %v1109_v27 }
 0x1c1   : > { %v1206_v49 = vpop.f32.mrf.mxu1 }
 0x1c2   : > { %v1219_v50 = vadd.f32 %v1206_v49, %v1110_v41  ;;  %v1250_v51 = vadd.f32 %v1233_v43, %v1218_v44 }
 0x1c4   : > { %v1251_v52 = vadd.f32 %v1233_v43, %v1219_v50  ;;  %vm1258_vm10 = vcmp.gt.f32.partialorder %v1250_v51, 0.0  ;;  %v1266_v54 = vmul.f32 0.01, %v1250_v51 }
 0x1c6   : > { %vm1259_vm11 = vcmp.gt.f32.partialorder %v1251_v52, 0.0  ;;  %v1267_v58 = vmul.f32 0.01, %v1251_v52  ;;  %v1274_v34 = vsel %vm1258_vm10, %v1250_v51, %v1266_v54  ;;  %v1071_v35 = vpop.f32.mrf.mxu2  ;;  %v1100_v59 = vpop.f32.mrf.mxu3 }
 0x1c7   : > { %1282 = vst [vmem:[%s2147_s7] sm:$0xff] %v1274_v34  ;;  %v1111_v45 = vadd.f32 %v1071_v35, %v1002_v56  ;;  %v1112_v62 = vadd.f32 %v1100_v59, %v1003_v57 }
 0x1c8   : > { %v1275_v47 = vsel %vm1259_vm11, %v1251_v52, %v1267_v58 }
 0x1c9   : > { %1283 = vst [vmem:[%s2147_s7 + $0x8] sm:$0xff] %v1275_v47  ;;  %v1180_v10 = vpop.f32.mrf.mxu0  ;;  %v1209_v12 = vpop.f32.mrf.mxu1 }
 0x1ca   : > { %v1220_v11 = vadd.f32 %v1180_v10, %v1111_v45  ;;  %v1221_v13 = vadd.f32 %v1209_v12, %v1112_v62 }
 0x1cc   : > { %v1252_v14 = vadd.f32 %v1238_v63, %v1220_v11  ;;  %v1253_v15 = vadd.f32 %v1238_v63, %v1221_v13 }
 0x1ce   : > { %vm1260_vm12 = vcmp.gt.f32.partialorder %v1252_v14, 0.0  ;;  %vm1261_vm13 = vcmp.gt.f32.partialorder %v1253_v15, 0.0  ;;  %v1268_v16 = vmul.f32 0.01, %v1252_v14  ;;  %v1269_v17 = vmul.f32 0.01, %v1253_v15  ;;  %v1074_v21 = vpop.f32.mrf.mxu2  ;;  %v1103_v23 = vpop.f32.mrf.mxu3 }
 0x1cf   : > { %v1113_v53 = vadd.f32 %v1074_v21, %v1004_v19  ;;  %v1114_v2 = vadd.f32 %v1103_v23, %v1005_v20 }
 0x1d0   : > { %v1276_v30 = vsel %vm1260_vm12, %v1252_v14, %v1268_v16  ;;  %v1277_v55 = vsel %vm1261_vm13, %v1253_v15, %v1269_v17 }
 0x1d1   : > { %1284 = vst [vmem:[%s2147_s7 + $0x10] sm:$0xff] %v1276_v30  ;;  %v1183_v31 = vpop.f32.mrf.mxu0  ;;  %v1212_v32 = vpop.f32.mrf.mxu1 }
 0x1d2   : > { %1285 = vst [vmem:[%s2147_s7 + $0x18] sm:$0xff] %v1277_v55  ;;  %v1222_v33 = vadd.f32 %v1183_v31, %v1113_v53  ;;  %v1223_v36 = vadd.f32 %v1212_v32, %v1114_v2 }
 0x1d4   : > { %v1254_v5 = vadd.f32 %v1243_v3, %v1222_v33  ;;  %v1255_v27 = vadd.f32 %v1243_v3, %v1223_v36 }
 0x1d6   : > { %vm1262_vm14 = vcmp.gt.f32.partialorder %v1254_v5, 0.0  ;;  %vm1263_vm15 = vcmp.gt.f32.partialorder %v1255_v27, 0.0  ;;  %v1270_v6 = vmul.f32 0.01, %v1254_v5  ;;  %v1271_v38 = vmul.f32 0.01, %v1255_v27  ;;  %v1077_v22 = vpop.f32.mrf.mxu2  ;;  %v1106_v40 = vpop.f32.mrf.mxu3 }
 0x1d7   : > { %v1115_v41 = vadd.f32 %v1077_v22, %v1006_v4  ;;  %v1116_v42 = vadd.f32 %v1106_v40, %v1007_v29 }
 0x1d8   : > { %v1278_v43 = vsel %vm1262_vm14, %v1254_v5, %v1270_v6  ;;  %v1279_v44 = vsel %vm1263_vm15, %v1255_v27, %v1271_v38 }
 0x1d9   : > { %1286 = vst [vmem:[%s2147_s7 + $0x20] sm:$0xff] %v1278_v43  ;;  %v1186_v46 = vpop.f32.mrf.mxu0  ;;  %v1215_v48 = vpop.f32.mrf.mxu1 }
 0x1da   : > { %1287 = vst [vmem:[%s2147_s7 + $0x28] sm:$0xff] %v1279_v44  ;;  %v1224_v24 = vadd.f32 %v1186_v46, %v1115_v41  ;;  %v1225_v49 = vadd.f32 %v1215_v48, %v1116_v42 }
 0x1dc   : > { %v1256_v50 = vadd.f32 %v1248_v26, %v1224_v24  ;;  %v1257_v51 = vadd.f32 %v1248_v26, %v1225_v49 }
 0x1de   : > { %vm1264_vm0 = vcmp.gt.f32.partialorder %v1256_v50, 0.0  ;;  %vm1265_vm1 = vcmp.gt.f32.partialorder %v1257_v51, 0.0  ;;  %v1272_v37 = vmul.f32 0.01, %v1256_v50  ;;  %v1273_v39 = vmul.f32 0.01, %v1257_v51 }
 0x1e0   : > { %v1280_v52 = vsel %vm1264_vm0, %v1256_v50, %v1272_v37  ;;  %v1281_v54 = vsel %vm1265_vm1, %v1257_v51, %v1273_v39 }
 0x1e1   : > { %1288 = vst [vmem:[%s2147_s7 + $0x30] sm:$0xff] %v1280_v52 }
 0x1e2   : > { %1289 = vst [vmem:[%s2147_s7 + $0x38] sm:$0xff] %v1281_v54 }
 0x1e3   : > { %1697 = shalt.err (!%p1694_p10)
}
 0x1e4   : > { %s1761_s9 = smov 256  }
 0x1e5   : > { %1535 = dma.vmem_to_hbm [thread:$0]  (%p1847_p13), %s1304_s19, 1024, %s1306_s22, %s1291_s21, %s1761_s9, %s1761_s9, %s1746_s27  }
 0x1e6 PF: > { %s1320_s23 = sand.u32 1, %s1728_s15   ;;  %p2212_p11 = scmp.ge.s32.totalorder %s1740_s18, 2 }
 0x1e7   : > { %s1321_s7 = scalar_lea.sflag [#allocation4], %s1320_s23 }
 0x1e8   : > { %p1546_p0 = pnand %p2212_p11, %p1852_p4 }
 0x1ea   : > { %p1547_p2 = pneg %p1546_p0 }
 0x1ec   : > { %1723 = dma.done.wait (%p1547_p2), %s1321_s7, 1024  }
 0x1ed   : > { %1725 = vsyncadd (%p1547_p2), %s1321_s7, 4294966272  ;;  %p18_p6 = scmp.ge.s32.totalorder %s1827_s29, 4   ;;  %s2213_s15 = smov %s1732_s16 }
 0x1ee   : > { %s2214_s16 = smov %s1736_s17  ;;  %s2215_s17 = smov %s1839_s6 }
 0x1ef   : > { %s2216_s18 = smov %s1827_s29  ;;  %20 = sbr.rel (!%p18_p6) target bundleno = 6 (0x6), region = 91 }
 0x1f4   :  { %1327 = vsyncpa [#allocation3], 1 }
 0x1f5   :  { %1329 = vsyncpa [#allocation3 + $0x1], 1 }
 0x1f6   :  { %1330 = vsyncpa [#allocation6], 1 }
 0x1f7   :  { %1331 = vsyncpa [#allocation4], 1 }
 0x1f8   :  { %1333 = vsyncpa [#allocation4 + $0x1], 1 }

</bundles_post_ra>
